<compile_context>
chip_gen: v6e
topology: v6e:2x2x1
jax: 0.10.0
libtpu: 0.0.40
codegen_flags: <defaults>
</compile_context>

<pallas_src>
import functools

import jax
import jax.numpy as jnp
from jax.experimental import pallas as pl
from jax.experimental.pallas import tpu as pltpu


def _round_up(x, m):
    return ((x + m - 1) // m) * m


def _linear_kernel(x_ref, w_ref, b_ref, o_ref, acc_ref):
    # x_ref: (tm, tk)  w_ref: (tk, tn)  b_ref: (1, tn) f32
    # o_ref: (tm, tn)  acc_ref: (tm, tn) f32 scratch (persists across K steps)
    k = pl.program_id(2)

    @pl.when(k == 0)
    def _():
        acc_ref[...] = jnp.zeros_like(acc_ref)

    acc_ref[...] += jnp.dot(
        x_ref[...], w_ref[...], preferred_element_type=jnp.float32
    )

    @pl.when(k == pl.num_programs(2) - 1)
    def _():
        o_ref[...] = (acc_ref[...] + b_ref[...]).astype(o_ref.dtype)


@functools.partial(jax.jit, static_argnames=("tm", "tn", "tk", "compute_dtype"))
def lazy_linear_forward(x, w, b, tm=256, tn=512, tk=512, compute_dtype=None):
    """y = x @ w + b  with x: (..., K), w: (K, N) (pre-transposed), b: (N,)."""
    *lead, K = x.shape
    Kw, N = w.shape
    assert Kw == K, "weight first dim must match x's last dim"
    M = 1
    for d in lead:
        M *= d
    out_dtype = x.dtype

    if compute_dtype is not None:
        x = x.astype(compute_dtype)
        w = w.astype(compute_dtype)

    x2 = x.reshape(M, K)
    b2 = b.reshape(1, N).astype(jnp.float32)

    # Clip tiles to the (alignment-rounded) problem extents; keep (8, 128)
    # granularity so block shapes are always legal.
    tm = min(tm, _round_up(M, 8))
    tk = min(tk, _round_up(K, 128))
    tn = min(tn, _round_up(N, 128))

    Mp, Kp, Np = _round_up(M, tm), _round_up(K, tk), _round_up(N, tn)

    if (Mp, Kp) != (M, K):
        x2 = jnp.pad(x2, ((0, Mp - M), (0, Kp - K)))
    if (Kp, Np) != (K, N):
        w = jnp.pad(w, ((0, Kp - K), (0, Np - N)))
    if Np != N:
        b2 = jnp.pad(b2, ((0, 0), (0, Np - N)))

    grid = (Mp // tm, Np // tn, Kp // tk)

    itemsize = jnp.dtype(x2.dtype).itemsize
    # Double-buffered x/w/out tiles + f32 accumulator + bias tiles, plus headroom.
    vmem_bytes = (
        2 * (tm * tk + tk * tn + tm * tn) * itemsize
        + tm * tn * 4
        + 2 * tn * 4
    )
    vmem_limit = int(min(max(32 << 20, 2 * vmem_bytes), 100 << 20))

    cost = pl.CostEstimate(
        flops=2 * M * K * N,
        bytes_accessed=(M * K + K * N + M * N) * itemsize + N * 4,
        transcendentals=0,
    )

    out = pl.pallas_call(
        _linear_kernel,
        out_shape=jax.ShapeDtypeStruct((Mp, Np), out_dtype),
        grid_spec=pltpu.PrefetchScalarGridSpec(
            num_scalar_prefetch=0,
            grid=grid,
            in_specs=[
                pl.BlockSpec((tm, tk), lambda i, j, k: (i, k)),  # activations
                pl.BlockSpec((tk, tn), lambda i, j, k: (k, j)),  # weight
                pl.BlockSpec((1, tn), lambda i, j, k: (0, j)),   # bias (f32)
            ],
            out_specs=pl.BlockSpec((tm, tn), lambda i, j, k: (i, j)),
            scratch_shapes=[pltpu.VMEM((tm, tn), jnp.float32)],
        ),
        compiler_params=pltpu.CompilerParams(
            dimension_semantics=("parallel", "parallel", "arbitrary"),
            vmem_limit_bytes=vmem_limit,
        ),
        cost_estimate=cost,
    )(x2, w, b2)

    out = out[:M, :N]
    return out.reshape(*lead, N)


def init_lazy_linear_params(key, in_features, out_features, dtype=jnp.float32):
    """Init mirroring torch.nn.Linear, but the weight is stored pre-transposed
    as (in_features, out_features) so the kernel never needs a transpose copy.
    ("Lazy" init maps to inferring in_features from the first input's shape.)"""
    kw, kb = jax.random.split(key)
    bound = 1.0 / jnp.sqrt(jnp.asarray(in_features, dtype=jnp.float32))
    weight_t = jax.random.uniform(
        kw, (in_features, out_features), dtype=dtype, minval=-bound, maxval=bound
    )
    bias = jax.random.uniform(
        kb, (out_features,), dtype=dtype, minval=-bound, maxval=bound
    )
    return weight_t, bias


if __name__ == "__main__":
    key = jax.random.PRNGKey(0)

    # --- Small shapes consistent with the module: (batch, bag_size, in_features)
    batch, bag, in_features, out_features = 2, 8, 32, 512
    kx, kp, kx2, kp2 = jax.random.split(key, 4)

    x = jax.random.normal(kx, (batch, bag, in_features), dtype=jnp.float32)
    weight_t, bias = init_lazy_linear_params(kp, in_features, out_features)

    y = lazy_linear_forward(x, weight_t, bias)
    y = jax.block_until_ready(y)

    y_ref = x @ weight_t + bias
    assert y.shape == (batch, bag, out_features)
    assert jnp.allclose(y, y_ref, atol=1e-5, rtol=1e-5)

    # --- Larger, non-aligned shapes to exercise the M/N/K tiling + padding path.
    B2, S2, K2, N2 = 4, 250, 640, 768
    x2 = jax.random.normal(kx2, (B2, S2, K2), dtype=jnp.float32)
    w2_t, b2 = init_lazy_linear_params(kp2, K2, N2)

    y2 = lazy_linear_forward(x2, w2_t, b2)
    y2 = jax.block_until_ready(y2)

    y2_ref = jnp.matmul(x2, w2_t, precision=jax.lax.Precision.HIGHEST) + b2
    assert y2.shape == (B2, S2, N2)
    assert jnp.allclose(y2, y2_ref, atol=1e-3, rtol=1e-3)

    print("KERNEL_OK")
</pallas_src>

<mosaic_0001>
module attributes {stable_mosaic.version = 11 : i64} {
  func.func @_linear_kernel(%arg0: i32, %arg1: i32, %arg2: i32, %arg3: memref<16x128xf32, #tpu.memory_space<vmem>>, %arg4: memref<128x512xf32, #tpu.memory_space<vmem>>, %arg5: memref<1x512xf32, #tpu.memory_space<vmem>>, %arg6: memref<16x512xf32, #tpu.memory_space<vmem>>, %arg7: memref<16x512xf32, #tpu.memory_space<vmem>>) attributes {dimension_semantics = [#tpu.dimension_semantics<parallel>, #tpu.dimension_semantics<parallel>, #tpu.dimension_semantics<arbitrary>], iteration_bounds = array<i64: 1, 1, 1>, scalar_prefetch = 0 : i64, scratch_operands = 1 : i64, tpu.core_type = #tpu.core_type<tc>, window_params = [{transform_indices = @transform_0, window_bounds = array<i64: 16, 128>}, {transform_indices = @transform_1, window_bounds = array<i64: 128, 512>}, {transform_indices = @transform_2, window_bounds = array<i64: 1, 512>}, {transform_indices = @transform_3, window_bounds = array<i64: 16, 512>}]} {
    %c0_i32 = arith.constant 0 : i32
    %0 = arith.cmpi eq, %arg2, %c0_i32 : i32
    %1 = arith.extui %0 : i1 to i32
    %c0_i32_0 = arith.constant 0 : i32
    %2 = arith.cmpi ne, %1, %c0_i32_0 : i32
    scf.if %2 {
      %cst_10 = arith.constant 0.000000e+00 : f32
      %12 = vector.broadcast %cst_10 : f32 to vector<16x512xf32>
      %c0_11 = arith.constant 0 : index
      %c0_12 = arith.constant 0 : index
      %13 = vector.load %arg7[%c0_11, %c0_12] : memref<16x512xf32, #tpu.memory_space<vmem>>, vector<16x512xf32>
      tpu.vector_store %arg7[%c0_11, %c0_12], %12 {strides = array<i32>} : memref<16x512xf32, #tpu.memory_space<vmem>>, vector<16x512xf32>,
    } else {
    }
    %c0 = arith.constant 0 : index
    %c0_1 = arith.constant 0 : index
    %3 = vector.load %arg7[%c0, %c0_1] : memref<16x512xf32, #tpu.memory_space<vmem>>, vector<16x512xf32>
    %c0_2 = arith.constant 0 : index
    %c0_3 = arith.constant 0 : index
    %4 = vector.load %arg3[%c0_2, %c0_3] : memref<16x128xf32, #tpu.memory_space<vmem>>, vector<16x128xf32>
    %c0_4 = arith.constant 0 : index
    %c0_5 = arith.constant 0 : index
    %5 = vector.load %arg4[%c0_4, %c0_5] : memref<128x512xf32, #tpu.memory_space<vmem>>, vector<128x512xf32>
    %cst = arith.constant dense<0.000000e+00> : vector<16x512xf32>
    %6 = tpu.matmul %4, %5, %cst {dimension_numbers = #tpu.dot_dimension_numbers<[1], [0], [0], [1], [0, 0, 1, 1], [], []>} : vector<16x128xf32>, vector<128x512xf32>, vector<16x512xf32> -> vector<16x512xf32>
    %7 = arith.addf %3, %6 : vector<16x512xf32>
    %c0_6 = arith.constant 0 : index
    %c0_7 = arith.constant 0 : index
    %8 = vector.load %arg7[%c0_6, %c0_7] : memref<16x512xf32, #tpu.memory_space<vmem>>, vector<16x512xf32>
    tpu.vector_store %arg7[%c0_6, %c0_7], %7 {strides = array<i32>} : memref<16x512xf32, #tpu.memory_space<vmem>>, vector<16x512xf32>,
    %c0_i32_8 = arith.constant 0 : i32
    %9 = arith.cmpi eq, %arg2, %c0_i32_8 : i32
    %10 = arith.extui %9 : i1 to i32
    %c0_i32_9 = arith.constant 0 : i32
    %11 = arith.cmpi ne, %10, %c0_i32_9 : i32
    scf.if %11 {
      %c0_10 = arith.constant 0 : index
      %c0_11 = arith.constant 0 : index
      %12 = vector.load %arg7[%c0_10, %c0_11] : memref<16x512xf32, #tpu.memory_space<vmem>>, vector<16x512xf32>
      %c0_12 = arith.constant 0 : index
      %c0_13 = arith.constant 0 : index
      %13 = vector.load %arg5[%c0_12, %c0_13] : memref<1x512xf32, #tpu.memory_space<vmem>>, vector<1x512xf32>
      %14 = vector.broadcast %13 : vector<1x512xf32> to vector<16x512xf32>
      %15 = arith.addf %12, %14 : vector<16x512xf32>
      %c0_14 = arith.constant 0 : index
      %c0_15 = arith.constant 0 : index
      %16 = vector.load %arg6[%c0_14, %c0_15] : memref<16x512xf32, #tpu.memory_space<vmem>>, vector<16x512xf32>
      tpu.vector_store %arg6[%c0_14, %c0_15], %15 {strides = array<i32>} : memref<16x512xf32, #tpu.memory_space<vmem>>, vector<16x512xf32>,
    } else {
    }
    return
  }
  func.func @transform_0(%arg0: i32, %arg1: i32, %arg2: i32) -> (i32, i32) {
    %c0_i32 = arith.constant 0 : i32
    return %arg0, %arg2 : i32, i32
  }
  func.func @transform_1(%arg0: i32, %arg1: i32, %arg2: i32) -> (i32, i32) {
    %c0_i32 = arith.constant 0 : i32
    return %arg2, %arg1 : i32, i32
  }
  func.func @transform_2(%arg0: i32, %arg1: i32, %arg2: i32) -> (i32, i32) {
    %c0_i32 = arith.constant 0 : i32
    %c0_i32_0 = arith.constant 0 : i32
    return %c0_i32, %arg1 : i32, i32
  }
  func.func @transform_3(%arg0: i32, %arg1: i32, %arg2: i32) -> (i32, i32) {
    %c0_i32 = arith.constant 0 : i32
    return %arg0, %arg1 : i32, i32
  }
}

</mosaic_0001>

<bundles_post_ra>
// kernel: lazy_linear_forward.1
= control target key start
LH: loop header
LB: loop body
LE: loop exit
PB: predicated region body
PF: predicated region fallthrough
CT: control target
= control target key end

     0   :  { %s590_s0 = inlined_call_operand.vmem [shape: f32[16,128], index: 0, kind: input, shape index: {}]   ;;  %s591_s1 = inlined_call_operand.vmem [shape: f32[128,512], index: 1, kind: input, shape index: {}]   ;;  %s592_s2 = inlined_call_operand.vmem [shape: f32[1,512], index: 2, kind: input, shape index: {}]   ;;  %s593_s3 = inlined_call_operand.hbm [shape: f32[16,512], index: 3, kind: output, shape index: {}]  }
   0x1   :  { %v98_v0 = vld [vmem:[%s591_s1 + $0x1e8] sm:$0xff]  ;;  %v100_v1 = vld [vmem:[%s591_s1 + $0x1f8] sm:$0xff]  ;;  %v97_v2 = vld [vmem:[%s591_s1 + $0x1e0] sm:$0xff] }
   0x2   :  { %101 = vmatprep.subr.mxu0 %v98_v0  ;;  %178 = vmatprep.subr.mxu1 %v100_v1  ;;  %v99_v3 = vld [vmem:[%s591_s1 + $0x1f0] sm:$0xff]  ;;  %v94_v4 = vld [vmem:[%s591_s1 + $0x1c8] sm:$0xff]  ;;  %v96_v5 = vld [vmem:[%s591_s1 + $0x1d8] sm:$0xff] }
   0x3   :  { %102 = vmatpush1.msra.mxu0 %v97_v2  ;;  %179 = vmatpush1.msra.mxu1 %v99_v3  ;;  %v93_v6 = vld [vmem:[%s591_s1 + $0x1c0] sm:$0xff]  ;;  %v95_v7 = vld [vmem:[%s591_s1 + $0x1d0] sm:$0xff]  ;;  %v90_v8 = vld [vmem:[%s591_s1 + $0x1a8] sm:$0xff] }
   0x4   :  { %103 = vmatprep.subr.mxu0 %v94_v4  ;;  %180 = vmatprep.subr.mxu1 %v96_v5  ;;  %v92_v9 = vld [vmem:[%s591_s1 + $0x1b8] sm:$0xff]  ;;  %v89_v10 = vld [vmem:[%s591_s1 + $0x1a0] sm:$0xff]  ;;  %v91_v11 = vld [vmem:[%s591_s1 + $0x1b0] sm:$0xff] }
   0x5   :  { %104 = vmatpush1.msra.mxu0 %v93_v6  ;;  %181 = vmatpush1.msra.mxu1 %v95_v7  ;;  %v86_v12 = vld [vmem:[%s591_s1 + $0x188] sm:$0xff]  ;;  %v88_v13 = vld [vmem:[%s591_s1 + $0x198] sm:$0xff]  ;;  %v85_v14 = vld [vmem:[%s591_s1 + $0x180] sm:$0xff] }
   0x6   :  { %105 = vmatprep.subr.mxu0 %v90_v8  ;;  %182 = vmatprep.subr.mxu1 %v92_v9  ;;  %v87_v15 = vld [vmem:[%s591_s1 + $0x190] sm:$0xff]  ;;  %v82_v16 = vld [vmem:[%s591_s1 + $0x168] sm:$0xff]  ;;  %v84_v17 = vld [vmem:[%s591_s1 + $0x178] sm:$0xff] }
   0x7   :  { %106 = vmatpush1.msra.mxu0 %v89_v10  ;;  %183 = vmatpush1.msra.mxu1 %v91_v11  ;;  %v81_v18 = vld [vmem:[%s591_s1 + $0x160] sm:$0xff]  ;;  %v83_v19 = vld [vmem:[%s591_s1 + $0x170] sm:$0xff]  ;;  %v78_v20 = vld [vmem:[%s591_s1 + $0x148] sm:$0xff] }
   0x8   :  { %107 = vmatprep.subr.mxu0 %v86_v12  ;;  %184 = vmatprep.subr.mxu1 %v88_v13  ;;  %v80_v21 = vld [vmem:[%s591_s1 + $0x158] sm:$0xff]  ;;  %v77_v22 = vld [vmem:[%s591_s1 + $0x140] sm:$0xff]  ;;  %v79_v23 = vld [vmem:[%s591_s1 + $0x150] sm:$0xff] }
   0x9   :  { %108 = vmatpush1.msra.mxu0 %v85_v14  ;;  %185 = vmatpush1.msra.mxu1 %v87_v15  ;;  %v74_v24 = vld [vmem:[%s591_s1 + $0x128] sm:$0xff]  ;;  %v76_v25 = vld [vmem:[%s591_s1 + $0x138] sm:$0xff]  ;;  %v73_v26 = vld [vmem:[%s591_s1 + $0x120] sm:$0xff] }
   0xa   :  { %109 = vmatprep.subr.mxu0 %v82_v16  ;;  %186 = vmatprep.subr.mxu1 %v84_v17  ;;  %v75_v27 = vld [vmem:[%s591_s1 + $0x130] sm:$0xff]  ;;  %v70_v28 = vld [vmem:[%s591_s1 + $0x108] sm:$0xff]  ;;  %v72_v29 = vld [vmem:[%s591_s1 + $0x118] sm:$0xff] }
   0xb   :  { %110 = vmatpush1.msra.mxu0 %v81_v18  ;;  %187 = vmatpush1.msra.mxu1 %v83_v19  ;;  %v69_v30 = vld [vmem:[%s591_s1 + $0x100] sm:$0xff]  ;;  %v71_v31 = vld [vmem:[%s591_s1 + $0x110] sm:$0xff]  ;;  %v66_v32 = vld [vmem:[%s591_s1 + $0xe8] sm:$0xff] }
   0xc   :  { %111 = vmatprep.subr.mxu0 %v78_v20  ;;  %188 = vmatprep.subr.mxu1 %v80_v21  ;;  %v68_v33 = vld [vmem:[%s591_s1 + $0xf8] sm:$0xff]  ;;  %v65_v34 = vld [vmem:[%s591_s1 + $0xe0] sm:$0xff]  ;;  %v67_v35 = vld [vmem:[%s591_s1 + $0xf0] sm:$0xff] }
   0xd   :  { %112 = vmatpush1.msra.mxu0 %v77_v22  ;;  %189 = vmatpush1.msra.mxu1 %v79_v23  ;;  %v62_v36 = vld [vmem:[%s591_s1 + $0xc8] sm:$0xff]  ;;  %v64_v37 = vld [vmem:[%s591_s1 + $0xd8] sm:$0xff]  ;;  %v61_v38 = vld [vmem:[%s591_s1 + $0xc0] sm:$0xff] }
   0xe   :  { %113 = vmatprep.subr.mxu0 %v74_v24  ;;  %190 = vmatprep.subr.mxu1 %v76_v25  ;;  %v63_v39 = vld [vmem:[%s591_s1 + $0xd0] sm:$0xff]  ;;  %v58_v40 = vld [vmem:[%s591_s1 + $0xa8] sm:$0xff]  ;;  %v60_v41 = vld [vmem:[%s591_s1 + $0xb8] sm:$0xff] }
   0xf   :  { %114 = vmatpush1.msra.mxu0 %v73_v26  ;;  %191 = vmatpush1.msra.mxu1 %v75_v27  ;;  %v57_v42 = vld [vmem:[%s591_s1 + $0xa0] sm:$0xff]  ;;  %v59_v43 = vld [vmem:[%s591_s1 + $0xb0] sm:$0xff]  ;;  %v54_v44 = vld [vmem:[%s591_s1 + $0x88] sm:$0xff] }
  0x10   :  { %115 = vmatprep.subr.mxu0 %v70_v28  ;;  %192 = vmatprep.subr.mxu1 %v72_v29  ;;  %v56_v45 = vld [vmem:[%s591_s1 + $0x98] sm:$0xff]  ;;  %v53_v46 = vld [vmem:[%s591_s1 + $0x80] sm:$0xff]  ;;  %v55_v47 = vld [vmem:[%s591_s1 + $0x90] sm:$0xff] }
  0x11   :  { %116 = vmatpush1.msra.mxu0 %v69_v30  ;;  %193 = vmatpush1.msra.mxu1 %v71_v31  ;;  %v50_v48 = vld [vmem:[%s591_s1 + $0x68] sm:$0xff]  ;;  %v52_v49 = vld [vmem:[%s591_s1 + $0x78] sm:$0xff] }
  0x12   :  { %117 = vmatprep.subr.mxu0 %v66_v32  ;;  %194 = vmatprep.subr.mxu1 %v68_v33 }
  0x13   :  { %118 = vmatpush1.msra.mxu0 %v65_v34  ;;  %195 = vmatpush1.msra.mxu1 %v67_v35 }
  0x14   :  { %119 = vmatprep.subr.mxu0 %v62_v36  ;;  %196 = vmatprep.subr.mxu1 %v64_v37 }
  0x15   :  { %120 = vmatpush1.msra.mxu0 %v61_v38  ;;  %197 = vmatpush1.msra.mxu1 %v63_v39 }
  0x16   :  { %121 = vmatprep.subr.mxu0 %v58_v40  ;;  %198 = vmatprep.subr.mxu1 %v60_v41 }
  0x17   :  { %122 = vmatpush1.msra.mxu0 %v57_v42  ;;  %199 = vmatpush1.msra.mxu1 %v59_v43 }
  0x18   :  { %8 = vsyncpa [#allocation4], 0  ;;  %123 = vmatprep.subr.mxu0 %v54_v44  ;;  %200 = vmatprep.subr.mxu1 %v56_v45  ;;  %v49_v50 = vld [vmem:[%s591_s1 + $0x60] sm:$0xff]  ;;  %v51_v51 = vld [vmem:[%s591_s1 + $0x70] sm:$0xff]  ;;  %v362_v1 = vmov 0.0   ;;  %v284_v3 = vlaneseq }
  0x19   :  { %124 = vmatpush1.msra.mxu0 %v53_v46  ;;  %201 = vmatpush1.msra.mxu1 %v55_v47  ;;  %v46_v52 = vld [vmem:[%s591_s1 + $0x48] sm:$0xff]  ;;  %v48_v53 = vld [vmem:[%s591_s1 + $0x58] sm:$0xff]  ;;  %v45_v54 = vld [vmem:[%s591_s1 + $0x40] sm:$0xff] }
  0x1a   :  { %125 = vmatprep.subr.mxu0 %v50_v48  ;;  %202 = vmatprep.subr.mxu1 %v52_v49  ;;  %v47_v55 = vld [vmem:[%s591_s1 + $0x50] sm:$0xff]  ;;  %v42_v56 = vld [vmem:[%s591_s1 + $0x28] sm:$0xff]  ;;  %v44_v57 = vld [vmem:[%s591_s1 + $0x38] sm:$0xff]  ;;  %v285_v4 = vshrl.u32 %v284_v3, 7 }
  0x1b   :  { %126 = vmatpush1.msra.mxu0 %v49_v50  ;;  %203 = vmatpush1.msra.mxu1 %v51_v51  ;;  %v41_v58 = vld [vmem:[%s591_s1 + $0x20] sm:$0xff]  ;;  %v43_v59 = vld [vmem:[%s591_s1 + $0x30] sm:$0xff]  ;;  %v38_v60 = vld [vmem:[%s591_s1 + $0x8] sm:$0xff] }
  0x1c   :  { %127 = vmatprep.subr.mxu0 %v46_v52  ;;  %204 = vmatprep.subr.mxu1 %v48_v53  ;;  %v40_v61 = vld [vmem:[%s591_s1 + $0x18] sm:$0xff]  ;;  %v37_v62 = vld [vmem:[%s591_s1] sm:$0xff]  ;;  %v39_v63 = vld [vmem:[%s591_s1 + $0x10] sm:$0xff]  ;;  %v286_v5 = vsub.s32 0, %v285_v4  ;;  %v294_v6 = vsub.s32 2, %v285_v4  ;;  %v290_v8 = vsub.s32 1, %v285_v4 }
  0x1d   :  { %128 = vmatpush1.msra.mxu0 %v45_v54  ;;  %205 = vmatpush1.msra.mxu1 %v47_v55  ;;  %v35_v0 = vld [vmem:[%s590_s0] sm:$0xff]  ;;  %v36_v2 = vld [vmem:[%s590_s0 + $0x8] sm:$0xff]  ;;  %v298_v9 = vsub.s32 3, %v285_v4  ;;  %s363_s0 = smov [#allocation3]  }
  0x1e   :  { %129 = vmatprep.subr.mxu0 %v42_v56  ;;  %206 = vmatprep.subr.mxu1 %v44_v57  ;;  %v282_v7 = vld [vmem:[%s592_s2] sm:$0xf]  ;;  %s325_s10 = sshll.u32 %s363_s0, 4  ;;  %s326_s10 = int_to_ptr.vmem [resolvable:$true] %s325_s10 }
  0x1f   :  { %130 = vmatpush1.msra.mxu0 %v41_v58  ;;  %207 = vmatpush1.msra.mxu1 %v43_v59  ;;  %v287_v10 = vrot.slane %v282_v7, %v286_v5  ;;  %v295_v11 = vrot.slane %v282_v7, %v294_v6  ;;  %v291_v12 = vrot.slane %v282_v7, %v290_v8  ;;  %s340_s2 = scalar_lea.vmem %s326_s10, 1024  ;;  %p345_p1 = scmp.lt.s32.totalorder %s326_s10, %s326_s10 }
  0x20   :  { %131 = vmatprep.subr.mxu0 %v38_v60  ;;  %208 = vmatprep.subr.mxu1 %v40_v61  ;;  %v299_v13 = vrot.slane %v282_v7, %v298_v9  ;;  %p341_p0 = scmp.ne.s32.totalorder %s326_s10, %s340_s2  ;;  %p346_p2 = scmp.lt.s32.totalorder %s340_s2, %s340_s2 }
  0x21   :  { %132 = vmatpush1.msra.mxu0 %v37_v62  ;;  %165 = vmatprep.mubr.f32.mxu0 %v362_v1 }
  0x22   :  { %209 = vmatpush1.msra.mxu1 %v39_v63  ;;  %242 = vmatprep.mubr.f32.mxu1 %v362_v1  ;;  %p347_p3 = por %p346_p2, %p345_p1 }
  0x23   :  { %166 = vmatmul.mubr.f32.vlgmr.msra.gmra.mxu0 %v35_v0  ;;  %243 = vmatmul.mubr.f32.vlgmr.msra.gmra.mxu1 %v35_v0 }
  0x24   :  { %171 = vmatprep.mubr.f32.mxu0 %v362_v1  ;;  %248 = vmatprep.mubr.f32.mxu1 %v362_v1  ;;  %p348_p4 = pnand %p347_p3, %p341_p0 }
  0x27   :  { %172 = vmatmul.mubr.f32.gmra.mxu0 %v36_v2  ;;  %249 = vmatmul.mubr.f32.gmra.mxu1 %v36_v2 }
  0xe3   :  { %v167_v14 = vpop.f32.mrf.mxu0  ;;  %v244_v15 = vpop.f32.mrf.mxu1 }
  0xe4   :  { %v304_v16 = vadd.f32 %v287_v10, %v167_v14  ;;  %v306_v17 = vadd.f32 %v295_v11, %v244_v15 }
  0xe5   :  { %v169_v18 = vpop.f32.mrf.mxu0  ;;  %v246_v19 = vpop.f32.mrf.mxu1 }
  0xe6   :  { %312 = vst [vmem:[#allocation3] sm:$0xff] %v304_v16  ;;  %314 = vst [vmem:[#allocation3 + $0x10] sm:$0xff] %v306_v17  ;;  %v305_v20 = vadd.f32 %v291_v12, %v169_v18  ;;  %v307_v21 = vadd.f32 %v299_v13, %v246_v19 }
  0xe7   :  { %v173_v22 = vpop.f32.mrf.mxu0  ;;  %v250_v23 = vpop.f32.mrf.mxu1 }
  0xe8   :  { %313 = vst [vmem:[#allocation3 + $0x8] sm:$0xff] %v305_v20  ;;  %315 = vst [vmem:[#allocation3 + $0x18] sm:$0xff] %v307_v21  ;;  %v308_v24 = vadd.f32 %v287_v10, %v173_v22  ;;  %v310_v25 = vadd.f32 %v295_v11, %v250_v23 }
  0xe9   :  { %v175_v26 = vpop.f32.mrf.mxu0  ;;  %v252_v27 = vpop.f32.mrf.mxu1 }
  0xea   :  { %316 = vst [vmem:[#allocation3 + $0x20] sm:$0xff] %v308_v24  ;;  %318 = vst [vmem:[#allocation3 + $0x30] sm:$0xff] %v310_v25  ;;  %v309_v28 = vadd.f32 %v291_v12, %v175_v26  ;;  %v311_v29 = vadd.f32 %v299_v13, %v252_v27 }
  0xec   :  { %317 = vst [vmem:[#allocation3 + $0x28] sm:$0xff] %v309_v28  ;;  %319 = vst [vmem:[#allocation3 + $0x38] sm:$0xff] %v311_v29 }
  0xed   :  { %351 = shalt.err (!%p348_p4)
}
  0xee   :  { %s364_s11 = smov 512   ;;  %s365_s12 = smov 32  }
  0xef   :  { %331 = dma.vmem_to_hbm [thread:$0]  %s326_s10, 1024, %s593_s3, [#allocation4], %s364_s11, %s364_s11, %s365_s12  }
  0xf0   :  { %360 = dma.done.wait [#allocation4], 1024  }
  0xf1   :  { %361 = vsyncadd [#allocation4], 4294966272 }
  0xf2   :  { %335 = vsyncpa [#allocation4], 1 }

</bundles_post_ra>
